<compile_context>
chip_gen: v5e
topology: v5e:2x2
jax: 0.10.0
libtpu: 0.0.40
codegen_flags: <defaults>
</compile_context>

<pallas_src>
import functools

import jax
import jax.numpy as jnp
from jax.experimental import pallas as pl
from jax.experimental.pallas import tpu as pltpu


def _ce_kernel(logits_ref, target_ref, sum_ref, cnt_ref, *, ignore_index, num_pixels):
    t = pl.program_id(1)

    logits = logits_ref[0].astype(jnp.float32)      # (C, TP)  classes on sublanes
    tgt = target_ref[0]                             # (1, TP)  int32, pixels on lanes
    C, TP = logits.shape

    # Numerically stable log-softmax over the class (sublane) axis, fused with
    # the target-class gather: `shifted` is reused for both exp() and the select.
    m = jnp.max(logits, axis=0, keepdims=True)                      # (1, TP)
    shifted = logits - m                                            # (C, TP)
    sumexp = jnp.sum(jnp.exp(shifted), axis=0, keepdims=True)       # (1, TP)

    # (C, 1) column iota broadcast against (1, TP) target -> (C, TP) one-hot,
    # without materializing a full (C, TP) iota.
    cls_idx = jax.lax.broadcasted_iota(jnp.int32, (C, 1), 0)        # (C, 1)
    onehot = cls_idx == tgt                                         # (C, TP)
    tgt_shifted = jnp.sum(jnp.where(onehot, shifted, 0.0),
                          axis=0, keepdims=True)                    # (1, TP)

    # Mask both ignore_index pixels and the ragged tail of the last tile.
    # NOTE: masking is a select AFTER the math, so NaN/Inf from garbage in
    # padded tail columns cannot propagate into the sums.
    pix_idx = t * TP + jax.lax.broadcasted_iota(jnp.int32, (1, TP), 1)
    valid = (tgt != ignore_index) & (pix_idx < num_pixels)          # (1, TP)

    # -log_softmax[target] = log(sumexp) - (logit[target] - max)
    loss = jnp.where(valid, jnp.log(sumexp) - tgt_shifted, 0.0)     # (1, TP)

    # Lane-dense (1,1,1,128) partial-output block per (image, tile): the
    # partial sum lives in lane 0, the rest are zeros (summed away in wrapper).
    lane0 = jax.lax.broadcasted_iota(jnp.int32, (1, 128), 1) == 0
    sum_ref[...] = jnp.where(lane0, jnp.sum(loss), 0.0).reshape(1, 1, 1, 128)
    cnt_ref[...] = jnp.where(lane0, jnp.sum(valid.astype(jnp.float32)), 0.0
                             ).reshape(1, 1, 1, 128)


def cross_entropy_loss_2d(output_nchw, target_nhw, *, ignore_index=255,
                          tile_p=None, block_vmem_budget_bytes=12 << 20):
    """Equivalent of CrossEntropyLoss2d(weight=None, ignore_index=255, reduction='mean').

    output_nchw: (N, C, H, W) logits (f32 or bf16 — kept in its dtype in HBM).
    target_nhw:  (N, H, W) integer class ids (255 = ignore).
    Returns a scalar mean loss over non-ignored pixels (NaN if none, matching PyTorch).
    """
    N, C, H, W = output_nchw.shape
    HW = H * W

    # Free, contiguous reshapes only (no transpose, no pad, no upcast in HBM).
    logits = output_nchw.reshape(N, C, HW)
    target = target_nhw.reshape(N, 1, HW).astype(jnp.int32)

    # Derive the pixel tile from a VMEM block budget: double-buffered logits
    # block (C * itemsize bytes/pixel) + int32 target block (4 bytes/pixel).
    logit_bytes = jnp.dtype(output_nchw.dtype).itemsize
    bytes_per_pixel_col = 2 * (C * logit_bytes + 4)
    if tile_p is None:
        tile_p = (block_vmem_budget_bytes // (bytes_per_pixel_col * 128)) * 128
        tile_p = min(tile_p, 16384)
    tile_p = max(128, min(int(tile_p), pl.cdiv(HW, 128) * 128))
    tile_p = pl.cdiv(tile_p, 128) * 128
    num_tiles = pl.cdiv(HW, tile_p)
    grid = (N, num_tiles)

    # Explicit scoped-VMEM limit: lifts v5e's 16 MiB default, stays below
    # v7x's 64 MiB physical VMEM.
    block_bytes = bytes_per_pixel_col * tile_p
    vmem_limit = int(min(56 << 20, max(32 << 20, block_bytes + (4 << 20))))

    kernel = functools.partial(_ce_kernel, ignore_index=ignore_index, num_pixels=HW)

    loss_part, cnt_part = pl.pallas_call(
        kernel,
        out_shape=(
            jax.ShapeDtypeStruct((N, num_tiles, 1, 128), jnp.float32),
            jax.ShapeDtypeStruct((N, num_tiles, 1, 128), jnp.float32),
        ),
        grid_spec=pltpu.PrefetchScalarGridSpec(
            num_scalar_prefetch=0,
            grid=grid,
            in_specs=[
                pl.BlockSpec((1, C, tile_p), lambda n, t: (n, 0, t)),
                pl.BlockSpec((1, 1, tile_p), lambda n, t: (n, 0, t)),
            ],
            out_specs=[
                pl.BlockSpec((1, 1, 1, 128), lambda n, t: (n, t, 0, 0)),
                pl.BlockSpec((1, 1, 1, 128), lambda n, t: (n, t, 0, 0)),
            ],
        ),
        compiler_params=pltpu.CompilerParams(
            # Each (n, t) step writes its own partial block -> both grid axes
            # are independent; v7x's two TensorCores can split either axis.
            dimension_semantics=("parallel", "parallel"),
            vmem_limit_bytes=vmem_limit,
        ),
    )(logits, target)

    # 'mean' reduction with ignore_index: divide by number of non-ignored pixels.
    return jnp.sum(loss_part) / jnp.sum(cnt_part)


def _reference_loss(output_nchw, target_nhw, ignore_index=255):
    """Pure-JAX reference for correctness checking."""
    N, C, H, W = output_nchw.shape
    logits = jnp.transpose(output_nchw, (0, 2, 3, 1)).reshape(-1, C).astype(jnp.float32)
    target = target_nhw.reshape(-1).astype(jnp.int32)
    lse = jax.scipy.special.logsumexp(logits, axis=-1)
    tgt_clamped = jnp.clip(target, 0, C - 1)
    tgt_logit = jnp.take_along_axis(logits, tgt_clamped[:, None], axis=-1)[:, 0]
    valid = target != ignore_index
    loss = jnp.where(valid, lse - tgt_logit, 0.0)
    return jnp.sum(loss) / jnp.sum(valid.astype(jnp.float32))


if __name__ == "__main__":
    key = jax.random.PRNGKey(0)

    # Test 1: small, lane-aligned spatial size (HW = 256), f32 logits.
    k1, k2, k3, key = jax.random.split(key, 4)
    N, C, H, W = 2, 4, 16, 16
    output = jax.random.normal(k1, (N, C, H, W), dtype=jnp.float32)
    target = jax.random.randint(k2, (N, H, W), 0, C, dtype=jnp.int32)
    ignore_mask = jax.random.bernoulli(k3, 0.1, (N, H, W))
    target = jnp.where(ignore_mask, 255, target)

    loss = jax.block_until_ready(cross_entropy_loss_2d(output, target))
    ref = jax.block_until_ready(_reference_loss(output, target))
    assert jnp.allclose(loss, ref, rtol=1e-5, atol=1e-5), (loss, ref)

    # Test 2: ragged spatial size (HW = 130) with multiple pixel tiles, to
    # exercise per-tile partial outputs + in-kernel tail masking.
    k1, k2, k3, key = jax.random.split(key, 4)
    N2, C2, H2, W2 = 2, 5, 10, 13
    output2 = jax.random.normal(k1, (N2, C2, H2, W2), dtype=jnp.float32)
    target2 = jax.random.randint(k2, (N2, H2, W2), 0, C2, dtype=jnp.int32)
    ignore_mask2 = jax.random.bernoulli(k3, 0.15, (N2, H2, W2))
    target2 = jnp.where(ignore_mask2, 255, target2)

    loss2 = jax.block_until_ready(cross_entropy_loss_2d(output2, target2, tile_p=128))
    ref2 = jax.block_until_ready(_reference_loss(output2, target2))
    assert jnp.allclose(loss2, ref2, rtol=1e-5, atol=1e-5), (loss2, ref2)

    # Test 3: bf16 logits kept bf16 in HBM (kernel upcasts per tile in VMEM).
    k1, k2, k3, key = jax.random.split(key, 4)
    N3, C3, H3, W3 = 1, 8, 16, 16
    output3 = jax.random.normal(k1, (N3, C3, H3, W3), dtype=jnp.bfloat16)
    target3 = jax.random.randint(k2, (N3, H3, W3), 0, C3, dtype=jnp.int32)
    ignore_mask3 = jax.random.bernoulli(k3, 0.1, (N3, H3, W3))
    target3 = jnp.where(ignore_mask3, 255, target3)

    loss3 = jax.block_until_ready(cross_entropy_loss_2d(output3, target3))
    ref3 = jax.block_until_ready(_reference_loss(output3, target3))
    assert jnp.allclose(loss3, ref3, rtol=1e-4, atol=1e-4), (loss3, ref3)

    # TODO(synk): per-class `weight` tensor (weight != None) is not implemented;
    # the module's default (weight=None) is what this kernel reproduces.
    print("KERNEL_OK")
</pallas_src>

<mosaic_0001>
module attributes {stable_mosaic.version = 11 : i64} {
  func.func @_ce_kernel(%arg0: i32, %arg1: i32, %arg2: memref<1x4x256xf32, #tpu.memory_space<vmem>>, %arg3: memref<1x1x256xi32, #tpu.memory_space<vmem>>, %arg4: memref<1x1x1x128xf32, #tpu.memory_space<vmem>>, %arg5: memref<1x1x1x128xf32, #tpu.memory_space<vmem>>) attributes {dimension_semantics = [#tpu.dimension_semantics<parallel>, #tpu.dimension_semantics<parallel>], iteration_bounds = array<i64: 2, 1>, scalar_prefetch = 0 : i64, scratch_operands = 0 : i64, tpu.core_type = #tpu.core_type<tc>, window_params = [{transform_indices = @transform_0, window_bounds = array<i64: 1, 4, 256>}, {transform_indices = @transform_1, window_bounds = array<i64: 1, 1, 256>}, {transform_indices = @transform_2, window_bounds = array<i64: 1, 1, 1, 128>}, {transform_indices = @transform_3, window_bounds = array<i64: 1, 1, 1, 128>}]} {
    %c0 = arith.constant 0 : index
    %c0_0 = arith.constant 0 : index
    %c0_1 = arith.constant 0 : index
    %0 = vector.load %arg2[%c0, %c0_0, %c0_1] : memref<1x4x256xf32, #tpu.memory_space<vmem>>, vector<1x4x256xf32>
    %1 = vector.shape_cast %0 : vector<1x4x256xf32> to vector<4x256xf32>
    %c0_2 = arith.constant 0 : index
    %c0_3 = arith.constant 0 : index
    %c0_4 = arith.constant 0 : index
    %2 = vector.load %arg3[%c0_2, %c0_3, %c0_4] : memref<1x1x256xi32, #tpu.memory_space<vmem>>, vector<1x1x256xi32>
    %3 = vector.shape_cast %2 : vector<1x1x256xi32> to vector<1x256xi32>
    %cst = arith.constant dense<0xFF800000> : vector<256xf32>
    %4 = vector.multi_reduction <maximumf>, %1, %cst [0] : vector<4x256xf32> to vector<256xf32>
    %5 = vector.shape_cast %4 : vector<256xf32> to vector<1x256xf32>
    %6 = vector.broadcast %5 : vector<1x256xf32> to vector<4x256xf32>
    %7 = arith.subf %1, %6 : vector<4x256xf32>
    %8 = math.exp %7 : vector<4x256xf32>
    %cst_5 = arith.constant dense<0.000000e+00> : vector<256xf32>
    %9 = vector.multi_reduction <add>, %8, %cst_5 [0] : vector<4x256xf32> to vector<256xf32>
    %10 = vector.shape_cast %9 : vector<256xf32> to vector<1x256xf32>
    %11 = tpu.iota {dimensions = array<i32: 0>} : vector<4x1xi32>
    %12 = vector.broadcast %11 : vector<4x1xi32> to vector<4x256xi32>
    %13 = vector.broadcast %3 : vector<1x256xi32> to vector<4x256xi32>
    %14 = arith.cmpi eq, %12, %13 : vector<4x256xi32>
    %cst_6 = arith.constant 0.000000e+00 : f32
    %15 = vector.broadcast %cst_6 : f32 to vector<4x256xf32>
    %16 = arith.select %14, %7, %15 : vector<4x256xi1>, vector<4x256xf32>
    %cst_7 = arith.constant dense<0.000000e+00> : vector<256xf32>
    %17 = vector.multi_reduction <add>, %16, %cst_7 [0] : vector<4x256xf32> to vector<256xf32>
    %18 = vector.shape_cast %17 : vector<256xf32> to vector<1x256xf32>
    %c256_i32 = arith.constant 256 : i32
    %19 = arith.muli %arg1, %c256_i32 : i32
    %20 = tpu.iota {dimensions = array<i32: 1>} : vector<1x256xi32>
    %21 = vector.broadcast %19 : i32 to vector<1x256xi32>
    %22 = arith.addi %21, %20 : vector<1x256xi32>
    %c255_i32 = arith.constant 255 : i32
    %23 = vector.broadcast %c255_i32 : i32 to vector<1x256xi32>
    %24 = arith.cmpi ne, %3, %23 : vector<1x256xi32>
    %c256_i32_8 = arith.constant 256 : i32
    %25 = vector.broadcast %c256_i32_8 : i32 to vector<1x256xi32>
    %26 = arith.cmpi slt, %22, %25 : vector<1x256xi32>
    %27 = arith.andi %24, %26 : vector<1x256xi1>
    %28 = math.log %10 : vector<1x256xf32>
    %29 = arith.subf %28, %18 : vector<1x256xf32>
    %cst_9 = arith.constant 0.000000e+00 : f32
    %30 = vector.broadcast %cst_9 : f32 to vector<1x256xf32>
    %31 = arith.select %27, %29, %30 : vector<1x256xi1>, vector<1x256xf32>
    %32 = tpu.iota {dimensions = array<i32: 1>} : vector<1x128xi32>
    %c0_i32 = arith.constant 0 : i32
    %33 = vector.broadcast %c0_i32 : i32 to vector<1x128xi32>
    %34 = arith.cmpi eq, %32, %33 : vector<1x128xi32>
    %35 = vector.shape_cast %31 : vector<1x256xf32> to vector<1x1x256xf32>
    %cst_10 = arith.constant dense<0.000000e+00> : vector<1xf32>
    %36 = vector.multi_reduction <add>, %35, %cst_10 [1, 2] : vector<1x1x256xf32> to vector<1xf32>
    %37 = vector.shape_cast %36 : vector<1xf32> to vector<1x1x1xf32>
    %38 = vector.extract %37[0, 0, 0] : f32 from vector<1x1x1xf32>
    %cst_11 = arith.constant 0.000000e+00 : f32
    %39 = vector.broadcast %38 : f32 to vector<1x128xf32>
    %40 = vector.broadcast %cst_11 : f32 to vector<1x128xf32>
    %41 = arith.select %34, %39, %40 : vector<1x128xi1>, vector<1x128xf32>
    %42 = vector.shape_cast %41 : vector<1x128xf32> to vector<1x1x1x128xf32>
    %c0_12 = arith.constant 0 : index
    %c0_13 = arith.constant 0 : index
    %c0_14 = arith.constant 0 : index
    %c0_15 = arith.constant 0 : index
    %43 = vector.load %arg4[%c0_12, %c0_13, %c0_14, %c0_15] : memref<1x1x1x128xf32, #tpu.memory_space<vmem>>, vector<1x1x1x128xf32>
    tpu.vector_store %arg4[%c0_12, %c0_13, %c0_14, %c0_15], %42 {strides = array<i32>} : memref<1x1x1x128xf32, #tpu.memory_space<vmem>>, vector<1x1x1x128xf32>,
    %44 = arith.extui %27 : vector<1x256xi1> to vector<1x256xi32>
    %45 = arith.sitofp %44 : vector<1x256xi32> to vector<1x256xf32>
    %46 = vector.shape_cast %45 : vector<1x256xf32> to vector<1x1x256xf32>
    %cst_16 = arith.constant dense<0.000000e+00> : vector<1xf32>
    %47 = vector.multi_reduction <add>, %46, %cst_16 [1, 2] : vector<1x1x256xf32> to vector<1xf32>
    %48 = vector.shape_cast %47 : vector<1xf32> to vector<1x1x1xf32>
    %49 = vector.extract %48[0, 0, 0] : f32 from vector<1x1x1xf32>
    %cst_17 = arith.constant 0.000000e+00 : f32
    %50 = vector.broadcast %49 : f32 to vector<1x128xf32>
    %51 = vector.broadcast %cst_17 : f32 to vector<1x128xf32>
    %52 = arith.select %34, %50, %51 : vector<1x128xi1>, vector<1x128xf32>
    %53 = vector.shape_cast %52 : vector<1x128xf32> to vector<1x1x1x128xf32>
    %c0_18 = arith.constant 0 : index
    %c0_19 = arith.constant 0 : index
    %c0_20 = arith.constant 0 : index
    %c0_21 = arith.constant 0 : index
    %54 = vector.load %arg5[%c0_18, %c0_19, %c0_20, %c0_21] : memref<1x1x1x128xf32, #tpu.memory_space<vmem>>, vector<1x1x1x128xf32>
    tpu.vector_store %arg5[%c0_18, %c0_19, %c0_20, %c0_21], %53 {strides = array<i32>} : memref<1x1x1x128xf32, #tpu.memory_space<vmem>>, vector<1x1x1x128xf32>,
    return
  }
  func.func @transform_0(%arg0: i32, %arg1: i32) -> (i32, i32, i32) {
    %c0_i32 = arith.constant 0 : i32
    %c0_i32_0 = arith.constant 0 : i32
    return %arg0, %c0_i32, %arg1 : i32, i32, i32
  }
  func.func @transform_1(%arg0: i32, %arg1: i32) -> (i32, i32, i32) {
    %c0_i32 = arith.constant 0 : i32
    %c0_i32_0 = arith.constant 0 : i32
    return %arg0, %c0_i32, %arg1 : i32, i32, i32
  }
  func.func @transform_2(%arg0: i32, %arg1: i32) -> (i32, i32, i32, i32) {
    %c0_i32 = arith.constant 0 : i32
    %c0_i32_0 = arith.constant 0 : i32
    %c0_i32_1 = arith.constant 0 : i32
    return %arg0, %arg1, %c0_i32, %c0_i32_0 : i32, i32, i32, i32
  }
  func.func @transform_3(%arg0: i32, %arg1: i32) -> (i32, i32, i32, i32) {
    %c0_i32 = arith.constant 0 : i32
    %c0_i32_0 = arith.constant 0 : i32
    %c0_i32_1 = arith.constant 0 : i32
    return %arg0, %arg1, %c0_i32, %c0_i32_0 : i32, i32, i32, i32
  }
}

</mosaic_0001>

<bundles_post_ra>
// kernel: tpu_custom_call.1
= control target key start
LH: loop header
LB: loop body
LE: loop exit
PB: predicated region body
PF: predicated region fallthrough
CT: control target
= control target key end

     0   :  { %9 = vsyncpa [#allocation3], 0  ;;  %s1052_s0 = inlined_call_operand.hbm [shape: f32[2,4,256], index: 0, kind: input, shape index: {}]   ;;  %s1053_s1 = inlined_call_operand.hbm [shape: s32[2,1,256], index: 1, kind: input, shape index: {}]   ;;  %s1054_s2 = inlined_call_operand.hbm [shape: f32[2,1,1,128], index: 2, kind: output, shape index: {0}]   ;;  %s1055_s3 = inlined_call_operand.hbm [shape: f32[2,1,1,128], index: 3, kind: output, shape index: {1}]  }
   0x1   :  { %11 = vsyncpa [#allocation3 + $0x1], 0 }
   0x2   :  { %12 = vsyncpa [#allocation6], 0 }
   0x3   :  { %14 = vsyncpa [#allocation6 + $0x1], 0 }
   0x4   :  { %15 = vsyncpa [#allocation4], 0 }
   0x5   :  { %17 = vsyncpa [#allocation4 + $0x1], 0 }
   0x6   :  { %18 = vsyncpa [#allocation9], 0 }
   0x7   :  { %20 = vsyncpa [#allocation9 + $0x1], 0  ;;  %s880_s12 = smov 0   ;;  %s882_s13 = smov 0  }
   0x8   :  { %s884_s14 = smov 0   ;;  %s886_s15 = smov 0  }
   0x9   :  { %s888_s16 = smov 0   ;;  %s890_s17 = smov 0  }
   0xa LB: > { %s578_s18 = sadd.s32 4294967295, %s856_s17   ;;  %s579_s19 = sadd.s32 4294967294, %s856_s17   ;;  %s856_s17 = sphi %s890_s17, %s26_s17   ;;  %s852_s16 = sphi %s888_s16, %s1065_s16   ;;  %s848_s15 = sphi %s886_s15, %s1064_s15   ;;  %s844_s14 = sphi %s884_s14, %s1063_s14   ;;  %s840_s13 = sphi %s882_s13, %s1062_s13   ;;  %s836_s12 = sphi %s880_s12, %s1061_s12  }
   0xb   : > { %s38_s20 = sadd.s32 1, %s852_s16  ;;  %s47_s21 = sadd.s32 1, %s844_s14 }
   0xc   : > { %p40_p0 = scmp.ge.s32.totalorder %s38_s20, 2  ;;  %p54_p1 = scmp.ne.s32.totalorder %s844_s14, %s840_s13 }
   0xd   : > { %p55_p2 = scmp.eq.s32.totalorder %s856_s17, 0  ;;  %p60_p3 = scmp.ne.s32.totalorder %s840_s13, %s836_s12 }
   0xe   : > { %s1067_s20 = smov (%p40_p0, %s38_s20), 0  ;;  %p61_p5 = scmp.eq.s32.totalorder %s578_s18, 0 }
   0xf   : > { %p921_p4 = por %p55_p2, %p54_p1  ;;  %s42_s23 = ssub.s32 %s852_s16, %s1067_s20 }
  0x10   : > { %p114_p6 = scmp.eq.s32.totalorder %s578_s18, 1  ;;  %p45_p7 = scmp.eq.s32.totalorder %s42_s23, 0 }
  0x11   : > { %p927_p8 = por %p61_p5, %p60_p3  ;;  %p120_p10 = scmp.eq.s32.totalorder %s579_s19, 1 }
  0x12   : > { %p931_p9 = por %p114_p6, %p54_p1  ;;  %p581_p12 = scmp.ge.s32.totalorder %s856_s17, 2 }
  0x13   : > { %s936_s26 = scalar_select %p45_p7, %s844_s14, %s47_s21  }
  0x14   : > { %p938_p11 = por %p120_p10, %p60_p3  ;;  %p620_p13 = scmp.lt.s32.totalorder %s856_s17, 2 }
  0x15   : > { %s168_s28 = sand.u32 1, %s844_s14   ;;  %s593_s30 = sshll.u32 %s852_s16, 3 }
  0x16   : > { %s582_s29 = sshll.u32 %s168_s28, 3  ;;  %s179_s6 = scalar_lea.hbm %s1052_s0, %s593_s30 }
  0x17   : > { %s172_s7 = scalar_lea.vmem [#allocation2], %s582_s29  ;;  %s181_s9 = sshll.u32 %s179_s6, 4  ;;  %s182_s9 = int_to_ptr.hbm [resolvable:$true] %s181_s9 }
  0x18   : > { %s183_s8 = sshll.u32 %s172_s7, 4  ;;  %p951_p0 = pnand %p620_p13, %p921_p4  ;;  %s184_s8 = int_to_ptr.vmem [resolvable:$true] %s183_s8 }
  0x19   : > { %p587_p1 = scmp.ge.s32.totalorder %s856_s17, 1  ;;  %p209_p2 = scmp.lt.s32.totalorder %s856_s17, 3 }
  0x1a   : > { %s169_s11 = scalar_lea.sflag [#allocation3], %s168_s28  ;;  %s585_s18 = sshll.u32 %s168_s28, 1 }
  0x1b   : > { %609 = dma.hbm_to_vmem [thread:$0]  (!%p951_p0), %s182_s9, 128, %s184_s8, %s169_s11  }
  0x1c   : > { %p210_p3 = pnand %p587_p1, %p209_p2  ;;  %s586_s19 = sshll.u32 %s852_s16, 1 }
  0x1d   : > { %s200_s29 = scalar_lea.hbm %s1053_s1, %s586_s19  ;;  %s194_s30 = scalar_lea.vmem [#allocation5], %s585_s18 }
  0x1e   : > { %s204_s22 = sshll.u32 %s194_s30, 4  ;;  %s202_s4 = sshll.u32 %s200_s29, 4  ;;  %s205_s22 = int_to_ptr.vmem [resolvable:$true] %s204_s22  ;;  %s203_s4 = int_to_ptr.hbm [resolvable:$true] %s202_s4 }
  0x1f   : > { %s191_s5 = scalar_lea.sflag [#allocation6], %s168_s28  ;;  %213 = sbr.rel (%p210_p3) target bundleno = 315 (0x13b), region = 28 }
  0x20   : > { %612 = dma.hbm_to_vmem [thread:$0]  (!%p951_p0), %s203_s4, 32, %s205_s22, %s191_s5  }
  0x21   : > { %s966_s6 = sand.u32 (!%p210_p3), 1, %s840_s13  }
  0x22   : > { %s588_s7 = sshll.u32 (!%p210_p3), %s966_s6, 3  ;;  %s216_s8 = scalar_lea.sflag (!%p210_p3), [#allocation3], %s966_s6 }
  0x23   : > { %s219_s9 = scalar_lea.vmem (!%p210_p3), [#allocation2], %s588_s7 }
  0x24   : > { %819 = dma.done.wait (%p927_p8), %s216_s8, 128  }
  0x25   : > { %821 = vsyncadd (%p927_p8), %s216_s8, 4294967168  ;;  %s589_s28 = sshll.u32 %s966_s6, 1  ;;  %s226_s10 = scalar_lea.sflag [#allocation6], %s966_s6 }
  0x26   : > { %s229_s11 = scalar_lea.vmem [#allocation5], %s589_s28 }
  0x27   : > { %823 = dma.done.wait (%p927_p8), %s226_s10, 32  }
  0x28   : > { %825 = vsyncadd (%p927_p8), %s226_s10, 4294967264  ;;  %v263_v0 = vld [vmem:[%s219_s9] sm:$0xff]  ;;  %vm271_vm0 = vcmask 1043456   ;;  %v314_v22 = vlaneseq  ;;  %v264_v23 = vld [vmem:[%s229_s11] sm:$0x3]  ;;  %v858_v55 = vmov 1   ;;  %s428_s19 = scalar_lea.hbm %s1054_s2, %s848_s15  ;;  %s442_s5 = scalar_lea.hbm %s1055_s3, %s848_s15 }
  0x29   : > { %266 = vst [vmem:[#allocation1] ss:$2 sm:$0xff] %v263_v0  ;;  %v316_v31 = vperm.slane %v264_v23, 0  ;;  %v317_v32 = vperm.slane %v264_v23, 1  ;;  %v354_v56 = vrot.slane %v858_v55, 7  ;;  %vm355_vm3 = vcmask 1040384  }
  0x2a   : > { %v315_v28 = vshrl.u32 %v314_v22, 7  ;;  %vm349_vm4 = vcmp.ne.s32.totalorder %v264_v23, 255  ;;  %s254_s21 = scalar_lea.vmem [#allocation7], %s966_s6  ;;  %s432_s29 = sshll.u32 %s428_s19, 4  ;;  %s433_s29 = int_to_ptr.hbm [resolvable:$true] %s432_s29 }
  0x2b   : > { %v356_v62 = vsel %vm355_vm3, 1, %v354_v56  ;;  %s430_s23 = sshll.u32 %s254_s21, 4  ;;  %s415_s7 = scalar_lea.sflag [#allocation4], %s966_s6  ;;  %s431_s23 = int_to_ptr.vmem [resolvable:$true] %s430_s23 }
  0x2c   : > { %vm318_vm1 = vcmp.eq.s32.totalorder %v315_v28, %v316_v31  ;;  %vm319_vm2 = vcmp.eq.s32.totalorder %v315_v28, %v317_v32  ;;  %vm357_vm5 = vcmp.ne.s32.totalorder %v356_v62, 0  ;;  %s752_s8 = sshra.s32 %s433_s29, 4  ;;  %s758_s11 = scalar_lea.hbm %s1054_s2, 2  ;;  %s753_s8 = int_to_ptr.hbm [resolvable:$true] %s752_s8 }
  0x2d   : > { %vm358_vm6 = vmand %vm349_vm4, %vm357_vm5  ;;  %s754_s9 = scalar_lea.hbm %s753_s8, 1  ;;  %p759_p7 = scmp.lt.s32.totalorder %s753_s8, %s1054_s2 }
  0x2e   : > { %p755_p4 = scmp.ne.s32.totalorder %s753_s8, %s754_s9  ;;  %p760_p8 = scmp.lt.s32.totalorder %s758_s11, %s754_s9 }
  0x30   : > { %v267_v1 = vld.sshfl [vmem:[#allocation1] sm:$0xff pattern:$0x75316420]  ;;  %v268_v2 = vld.sshfl [vmem:[#allocation1 + $0x8] sm:$0xff pattern:$0x75316420]  ;;  %p756_p5 = pnand %p755_p4, %p931_p9  ;;  %p761_p10 = por %p760_p8, %p759_p7 }
  0x31   : > { %v272_v3 = vsel %vm271_vm0, %v267_v1, -inf  ;;  %v279_v4 = vsel %vm271_vm0, %v268_v2, -inf }
  0x32   : > { %v273_v5 = vrot.slane %v272_v3, 4  ;;  %v280_v6 = vrot.slane %v279_v4, 4  ;;  %p757_p6 = pneg %p756_p5 }
  0x34   : > { %v274_v7 = vmax.f32 %v272_v3, %v273_v5  ;;  %v281_v8 = vmax.f32 %v279_v4, %v280_v6  ;;  %p762_p13 = pnand %p761_p10, %p757_p6 }
  0x36   : > { %v275_v9 = vrot.slane %v274_v7, 2  ;;  %v282_v10 = vrot.slane %v281_v8, 2 }
  0x38   : > { %v276_v11 = vmax.f32 %v274_v7, %v275_v9  ;;  %v283_v12 = vmax.f32 %v281_v8, %v282_v10  ;;  %v859_v9 = vmov 0.0  }
  0x39   : > { %v590_v10 = vsel %vm358_vm6, 1.0, %v859_v9 }
  0x3a   : > { %v277_v13 = vrot.slane %v276_v11, 1  ;;  %v284_v14 = vrot.slane %v283_v12, 1 }
  0x3c   : > { %v278_v15 = vmax.f32 %v276_v11, %v277_v13  ;;  %v285_v16 = vmax.f32 %v283_v12, %v284_v14 }
  0x3e   : > { %v288_v17 = vrot.slane %v285_v16, 4  ;;  %v396_v16 = vperm.slane %v590_v10, 1 }
  0x40   : > { %v289_v18 = vsel %vm271_vm0, %v278_v15, %v288_v17  ;;  %v395_v15 = vperm.slane %v590_v10, 0 }
  0x41   : > { %v291_v19 = vsub.f32 %v263_v0, %v289_v18 }
  0x42   : > { %v399_v18 = vsel %vm355_vm3, %v395_v15, 0.0 }
  0x43   : > { %v292_v20 = vmul.f32 1.442695, %v291_v19 }
  0x45   : > { %672 = vpow2.f32 %v292_v20 }
  0x4b   : > { %v673_v21 = vpop.eup %672 }
  0x4c   : > { %295 = vst [vmem:[#allocation1] ss:$2 sm:$0xff] %v673_v21 }
  0x53   : > { %v296_v24 = vld.sshfl [vmem:[#allocation1] sm:$0xff pattern:$0x75316420]  ;;  %v297_v25 = vld.sshfl [vmem:[#allocation1 + $0x8] sm:$0xff pattern:$0x75316420] }
  0x54   : > { %v300_v26 = vsel %vm271_vm0, %v296_v24, 0.0  ;;  %v307_v27 = vsel %vm271_vm0, %v297_v25, 0.0  ;;  %321 = vst [vmem:[#allocation1] ss:$2 sm:$0xff] %v291_v19  ;;  %v400_v19 = vsel %vm355_vm3, %v396_v16, 0.0 }
  0x55   : > { %v301_v29 = vrot.slane %v300_v26, 4  ;;  %v308_v30 = vrot.slane %v307_v27, 4  ;;  %v401_v20 = vadd.f32 %v400_v19, %v399_v18 }
  0x57   : > { %v302_v33 = vadd.f32 %v301_v29, %v300_v26  ;;  %v309_v34 = vadd.f32 %v308_v30, %v307_v27 }
  0x59   : > { %v303_v35 = vrot.slane %v302_v33, 2  ;;  %v310_v36 = vrot.slane %v309_v34, 2 }
  0x5b   : > { %v304_v37 = vadd.f32 %v303_v35, %v302_v33  ;;  %v311_v38 = vadd.f32 %v310_v36, %v309_v34  ;;  %v322_v39 = vld.sshfl [vmem:[#allocation1] sm:$0xff pattern:$0x75316420]  ;;  %v323_v40 = vld.sshfl [vmem:[#allocation1 + $0x8] sm:$0xff pattern:$0x75316420] }
  0x5c   : > { %v326_v41 = vsel %vm318_vm1, %v322_v39, 0.0  ;;  %v327_v42 = vsel %vm319_vm2, %v323_v40, 0.0  ;;  %v344_v36 = vand.u32 127, %v314_v22 }
  0x5d   : > { %v305_v43 = vrot.slane %v304_v37, 1  ;;  %v312_v44 = vrot.slane %v311_v38, 1  ;;  %v328_v45 = vsel %vm271_vm0, %v326_v41, 0.0  ;;  %v335_v46 = vsel %vm271_vm0, %v327_v42, 0.0 }
  0x5e   : > { %v329_v47 = vrot.slane %v328_v45, 4  ;;  %v336_v48 = vrot.slane %v335_v46, 4  ;;  %vm371_vm7 = vcmp.eq.s32.totalorder %v344_v36, 0 }
  0x5f   : > { %v306_v49 = vadd.f32 %v305_v43, %v304_v37  ;;  %v313_v50 = vadd.f32 %v312_v44, %v311_v38 }
  0x60   : > { %v330_v51 = vadd.f32 %v329_v47, %v328_v45  ;;  %v337_v52 = vadd.f32 %v336_v48, %v335_v46 }
  0x61   : > { %674 = vlog2.f32 %v306_v49 }
  0x62   : > { %v331_v53 = vrot.slane %v330_v51, 2  ;;  %v338_v54 = vrot.slane %v337_v52, 2  ;;  %676 = vlog2.f32 %v313_v50 }
  0x64   : > { %v332_v57 = vadd.f32 %v331_v53, %v330_v51  ;;  %v339_v58 = vadd.f32 %v338_v54, %v337_v52 }
  0x66   : > { %v333_v59 = vrot.slane %v332_v57, 1  ;;  %v340_v60 = vrot.slane %v339_v58, 1 }
  0x67   : > { %v675_v61 = vpop.eup %674 }
  0x68   : > { %v677_v63 = vpop.eup %676  ;;  %v334_v0 = vadd.f32 %v333_v59, %v332_v57  ;;  %v341_v1 = vadd.f32 %v340_v60, %v339_v58  ;;  %v360_v2 = vmul.f32 0.6931472, %v675_v61 }
  0x69   : > { %v362_v3 = vmul.f32 0.6931472, %v677_v63 }
  0x6a   : > { %v363_v4 = vsub.f32 %v360_v2, %v334_v0 }
  0x6b   : > { %v364_v5 = vsub.f32 %v362_v3, %v341_v1 }
  0x6d   : > { %v367_v6 = vrot.slane %v364_v5, 7 }
  0x6f   : > { %v368_v7 = vsel %vm355_vm3, %v363_v4, %v367_v6 }
  0x70   : > { %v370_v8 = vsel %vm358_vm6, %v368_v7, 0.0 }
  0x71   : > { %v373_v11 = vperm.slane %v370_v8, 0  ;;  %v374_v12 = vperm.slane %v370_v8, 1 }
  0x73   : > { %v377_v13 = vsel %vm355_vm3, %v373_v11, 0.0  ;;  %v378_v14 = vsel %vm355_vm3, %v374_v12, 0.0 }
  0x74   : > { %v379_v17 = vadd.f32 %v378_v14, %v377_v13 }
  0x76   : > { %380 = vadd.xlane.f32.xlu0 %v379_v17 }
  0x7e   : > { %402 = vadd.xlane.f32.xlu0 %v401_v20 }
  0xe9   : > { %v381_v21 = vpop.xlane.xlu0 %380 }
  0xea   : > { %v382_v23 = vrot.slane %v381_v21, 4 }
  0xec   : > { %v383_v24 = vadd.f32 %v382_v23, %v381_v21 }
  0xee   : > { %v384_v25 = vrot.slane %v383_v24, 2 }
  0xf0   : > { %v385_v26 = vadd.f32 %v384_v25, %v383_v24 }
  0xf1   : > { %v403_v27 = vpop.xlane.xlu0 %402 }
  0xf2   : > { %v404_v28 = vrot.slane %v403_v27, 4  ;;  %v386_v29 = vrot.slane %v385_v26, 1 }
  0xf4   : > { %v405_v30 = vadd.f32 %v404_v28, %v403_v27  ;;  %v387_v31 = vadd.f32 %v386_v29, %v385_v26 }
  0xf6   : > { %v406_v32 = vrot.slane %v405_v30, 2  ;;  %594 = vpush %v387_v31 }
  0xf8   : > { %v407_v33 = vadd.f32 %v406_v32, %v405_v30 }
  0xfa   : > { %v408_v34 = vrot.slane %v407_v33, 1 }
  0xfc   : > { %v409_v35 = vadd.f32 %v408_v34, %v407_v33 }
  0xfe   : > { %596 = vpush %v409_v35 }
 0x127   : > { %s595_s30 = spop %594 }
 0x128   : > { %v389_v37 = vstv %s595_s30 }
 0x129   : > { %v390_v38 = vsel %vm371_vm7, %v389_v37, 0.0 }
 0x12a   : > { %391 = vst [vmem:[%s254_s21] sm:$0x1] %v390_v38 }
 0x12b   : > { %765 = shalt.err (!%p762_p13)
}
 0x12c   : > { %602 = dma.vmem_to_hbm [thread:$0]  (%p931_p9), %s431_s23, 16, %s433_s29, %s415_s7  }
 0x12d   : > { %s260_s15 = scalar_lea.vmem [#allocation8], %s966_s6  ;;  %s446_s21 = sshll.u32 %s442_s5, 4  ;;  %s447_s21 = int_to_ptr.hbm [resolvable:$true] %s446_s21 }
 0x12e   : > { %s444_s19 = sshll.u32 %s260_s15, 4  ;;  %s419_s22 = scalar_lea.sflag [#allocation9], %s966_s6  ;;  %s445_s19 = int_to_ptr.vmem [resolvable:$true] %s444_s19 }
 0x12f   : > { %s597_s30 = spop %596  ;;  %s780_s4 = sshra.s32 %s447_s21, 4  ;;  %s781_s4 = int_to_ptr.hbm [resolvable:$true] %s780_s4 }
 0x130   : > { %v411_v22 = vstv %s597_s30  ;;  %s782_s8 = scalar_lea.hbm %s781_s4, 1  ;;  %s786_s29 = scalar_lea.hbm %s1055_s3, 2 }
 0x131   : > { %v412_v39 = vsel %vm371_vm7, %v411_v22, 0.0  ;;  %p783_p0 = scmp.ne.s32.totalorder %s781_s4, %s782_s8  ;;  %p787_p3 = scmp.lt.s32.totalorder %s781_s4, %s1055_s3 }
 0x132   : > { %413 = vst [vmem:[%s260_s15] sm:$0x1] %v412_v39  ;;  %p788_p4 = scmp.lt.s32.totalorder %s786_s29, %s782_s8 }
 0x133   : > { %p784_p1 = pnand %p783_p0, %p931_p9 }
 0x134   : > { %p789_p5 = por %p788_p4, %p787_p3 }
 0x135   : > { %p785_p2 = pneg %p784_p1 }
 0x137   : > { %p790_p6 = pnand %p789_p5, %p785_p2 }
 0x139   : > { %793 = shalt.err (!%p790_p6)
}
 0x13a   : > { %603 = dma.vmem_to_hbm [thread:$0]  (%p931_p9), %s445_s19, 16, %s447_s21, %s419_s22  }
 0x13b PF: > { %s458_s6 = sand.u32 1, %s836_s12   ;;  %p614_p7 = pnand %p581_p12, %p938_p11 }
 0x13c   : > { %s459_s28 = scalar_lea.sflag [#allocation4], %s458_s6 }
 0x13d   : > { %p615_p8 = pneg %p614_p7 }
 0x13f   : > { %827 = dma.done.wait (%p615_p8), %s459_s28, 16  }
 0x140   : > { %829 = vsyncadd (%p615_p8), %s459_s28, 4294967280  ;;  %s468_s10 = scalar_lea.sflag [#allocation9], %s458_s6 }
 0x141   : > { %831 = dma.done.wait (%p615_p8), %s468_s10, 16  }
 0x142   : > { %833 = vsyncadd (%p615_p8), %s468_s10, 4294967280  ;;  %s26_s17 = sadd.s32 1, %s856_s17   ;;  %s1061_s12 = smov %s840_s13 }
 0x143   : > { %p23_p10 = scmp.ge.s32.totalorder %s26_s17, 4   ;;  %s1062_s13 = smov %s844_s14 }
 0x144   : > { %s1063_s14 = smov %s936_s26  ;;  %s1064_s15 = smov %s852_s16 }
 0x145   : > { %s1065_s16 = smov %s1067_s20  ;;  %25 = sbr.rel (!%p23_p10) target bundleno = 10 (0xa), region = 103 }
 0x14a   :  { %473 = vsyncpa [#allocation3], 1 }
 0x14b   :  { %475 = vsyncpa [#allocation3 + $0x1], 1 }
 0x14c   :  { %476 = vsyncpa [#allocation6], 1 }
 0x14d   :  { %478 = vsyncpa [#allocation6 + $0x1], 1 }
 0x14e   :  { %479 = vsyncpa [#allocation4], 1 }
 0x14f   :  { %481 = vsyncpa [#allocation4 + $0x1], 1 }
 0x150   :  { %482 = vsyncpa [#allocation9], 1 }
 0x151   :  { %484 = vsyncpa [#allocation9 + $0x1], 1 }

</bundles_post_ra>
